<compile_context>
chip_gen: v6e
topology: v6e:2x2x1
jax: 0.10.0
libtpu: 0.0.40
codegen_flags: <defaults>
</compile_context>

<pallas_src>
import functools

import jax
import jax.numpy as jnp
import numpy as np
from jax.experimental import pallas as pl
from jax.experimental.pallas import tpu as pltpu

EPS = 1e-5
_LANE = 128


def _sublane_for(dtype):
    """Sublane granularity of the second-to-last block dim for this dtype."""
    itemsize = jnp.dtype(dtype).itemsize
    return max(8, 32 // max(itemsize, 1))   # 8 f32 / 16 bf16 / 32 int8-fp8


@functools.lru_cache(maxsize=1)
def _hw_params():
    """Generation-aware budgets: (vmem_limit_bytes, fit_budget_bytes, num_cores)."""
    phys_vmem = 64 << 20          # conservative fallback if the query fails
    num_cores = 1
    try:
        info = pltpu.get_tpu_info()
        cap = getattr(info, "vmem_capacity_bytes", None)
        if cap:
            phys_vmem = int(cap)
    except Exception:
        pass
    try:
        kind = jax.devices()[0].device_kind.lower()
    except Exception:
        kind = ""

    if phys_vmem >= (128 << 20):
        vmem_limit = 96 << 20                       # v5e / v6e: 128 MiB VMEM, 1 TC
    else:
        vmem_limit = max(phys_vmem - (16 << 20), 16 << 20)   # v7x-class: 64 MiB VMEM
        num_cores = 2
    if "v7" in kind:                                # 2 TCs / chip, 64 MiB per TC
        num_cores = max(num_cores, 2)
        vmem_limit = min(vmem_limit, 48 << 20)

    fit_budget = int(vmem_limit * 0.9)              # headroom for compiler scratch
    return vmem_limit, fit_budget, num_cores


def _tile_candidates(total, mult):
    """Valid channel tiles: the full dim, or divisors that are multiples of
    the (dtype-dependent) sublane granularity.  Sorted descending."""
    cands = {total}
    d = mult
    while d < total:
        if total % d == 0:
            cands.add(d)
        d += mult
    return sorted(cands, reverse=True)


# ----------------------------------------------------------------------------
# One-pass kernel: stats + normalize + ReLU6 fused, x read from HBM once.
# ----------------------------------------------------------------------------
def _one_pass_kernel(x_ref, g_ref, b_ref, o_ref, *, inv_count):
    xf = x_ref[...].astype(jnp.float32)                              # (N, C_T, HW)
    # Sum over N first (cheap cross-vreg VPU adds), then the lane reduce; the
    # square / FMA / clip below are algorithmic and already map to the VPU.
    s = jnp.sum(jnp.sum(xf, axis=0), axis=-1, keepdims=True)         # (C_T, 1)
    ss = jnp.sum(jnp.sum(xf * xf, axis=0), axis=-1, keepdims=True)   # (C_T, 1)
    mean = s * inv_count                       # compile-time 1/(N*H*W)
    var = jnp.maximum(ss * inv_count - mean * mean, 0.0)   # biased var, clamped
    scale = g_ref[...] * jax.lax.rsqrt(var + EPS)          # (C_T, 1)
    shift = b_ref[...] - mean * scale                      # fold BN into one FMA
    y = xf * scale[None] + shift[None]                     # reuse the f32 cast
    o_ref[...] = jnp.clip(y, 0.0, 6.0).astype(o_ref.dtype)


def _bnrelu_one_pass(x3, gamma2, beta2, c_tile, inv_count, vmem_limit):
    N, C, HW = x3.shape
    grid = (C // c_tile,)
    kernel = functools.partial(_one_pass_kernel, inv_count=inv_count)
    return pl.pallas_call(
        kernel,
        out_shape=jax.ShapeDtypeStruct((N, C, HW), x3.dtype),
        grid_spec=pltpu.PrefetchScalarGridSpec(
            num_scalar_prefetch=0,
            grid=grid,
            in_specs=[
                pl.BlockSpec((N, c_tile, HW), lambda c: (0, c, 0)),
                pl.BlockSpec((c_tile, 1), lambda c: (c, 0)),
                pl.BlockSpec((c_tile, 1), lambda c: (c, 0)),
            ],
            out_specs=pl.BlockSpec((N, c_tile, HW), lambda c: (0, c, 0)),
        ),
        compiler_params=pltpu.CompilerParams(
            dimension_semantics=("parallel",),
            vmem_limit_bytes=vmem_limit,
        ),
    )(x3, gamma2, beta2)


# ----------------------------------------------------------------------------
# Two-pass fallback: (1) stats accumulation, (2) streaming scale/shift + ReLU6.
# ----------------------------------------------------------------------------
def _bnrelu_two_pass(x3, gamma2, beta2, c_tile, l_tile, inv_count, vmem_limit):
    N, C, HW = x3.shape
    n_c = C // c_tile
    n_l = pl.cdiv(HW, l_tile)
    mask_tail = (HW % l_tile) != 0        # lane-aligned tiles + masked edge

    # ---- pass 1: per-channel sum and sum-of-squares (f32 accumulation) ----
    def stats_kernel(x_ref, sum_ref, ssq_ref):
        n_id = pl.program_id(1)
        l_id = pl.program_id(2)

        @pl.when((n_id == 0) & (l_id == 0))
        def _():
            sum_ref[...] = jnp.zeros_like(sum_ref)
            ssq_ref[...] = jnp.zeros_like(ssq_ref)

        xf = x_ref[0].astype(jnp.float32)                 # (C_TILE, L_TILE)
        if mask_tail:
            valid = HW - l_id * l_tile                    # >= l_tile except tail
            lane = jax.lax.broadcasted_iota(jnp.int32, xf.shape, 1)
            xf = jnp.where(lane < valid, xf, 0.0)
        sum_ref[...] += jnp.sum(xf, axis=1, keepdims=True)
        ssq_ref[...] += jnp.sum(xf * xf, axis=1, keepdims=True)

    sums, ssqs = pl.pallas_call(
        stats_kernel,
        out_shape=(jax.ShapeDtypeStruct((C, 1), jnp.float32),
                   jax.ShapeDtypeStruct((C, 1), jnp.float32)),
        grid_spec=pltpu.PrefetchScalarGridSpec(
            num_scalar_prefetch=0,
            grid=(n_c, N, n_l),
            in_specs=[pl.BlockSpec((1, c_tile, l_tile), lambda c, n, l: (n, c, l))],
            out_specs=(pl.BlockSpec((c_tile, 1), lambda c, n, l: (c, 0)),
                       pl.BlockSpec((c_tile, 1), lambda c, n, l: (c, 0))),
        ),
        compiler_params=pltpu.CompilerParams(
            dimension_semantics=("parallel", "arbitrary", "arbitrary"),
            vmem_limit_bytes=vmem_limit,
        ),
    )(x3)

    # Tiny (C, 1) host-side math: fold BN into per-channel scale/shift.
    mean = sums * inv_count
    var = jnp.maximum(ssqs * inv_count - mean * mean, 0.0)
    scale = gamma2 * jax.lax.rsqrt(var + EPS)
    shift = beta2 - mean * scale

    # ---- pass 2: streaming apply  o = clip(x*scale + shift, 0, 6) ---------
    def apply_kernel(x_ref, scale_ref, shift_ref, o_ref):
        xf = x_ref[...].astype(jnp.float32)
        y = xf * scale_ref[...][None] + shift_ref[...][None]
        o_ref[...] = jnp.clip(y, 0.0, 6.0).astype(o_ref.dtype)

    return pl.pallas_call(
        apply_kernel,
        out_shape=jax.ShapeDtypeStruct((N, C, HW), x3.dtype),
        grid_spec=pltpu.PrefetchScalarGridSpec(
            num_scalar_prefetch=0,
            grid=(n_c, N, n_l),
            in_specs=[
                pl.BlockSpec((1, c_tile, l_tile), lambda c, n, l: (n, c, l)),
                pl.BlockSpec((c_tile, 1), lambda c, n, l: (c, 0)),
                pl.BlockSpec((c_tile, 1), lambda c, n, l: (c, 0)),
            ],
            out_specs=pl.BlockSpec((1, c_tile, l_tile), lambda c, n, l: (n, c, l)),
        ),
        compiler_params=pltpu.CompilerParams(
            dimension_semantics=("parallel", "parallel", "parallel"),
            vmem_limit_bytes=vmem_limit,
        ),
    )(x3, scale, shift)


# ----------------------------------------------------------------------------
# Public wrapper
# ----------------------------------------------------------------------------
def bnrelu(x_nchw, gamma, beta, *, block_budget_bytes=None, force_two_pass=False):
    N, C, H, W = x_nchw.shape
    HW = H * W
    inv_count = 1.0 / float(N * HW)

    # Free reshape: NCHW -> (N, C, H*W).  No HBM transpose.
    x3 = x_nchw.reshape(N, C, HW)
    gamma2 = gamma.reshape(C, 1).astype(jnp.float32)
    beta2 = beta.reshape(C, 1).astype(jnp.float32)

    vmem_limit, fit_budget, num_cores = _hw_params()
    if block_budget_bytes is not None:       # test hook / manual override
        fit_budget = int(block_budget_bytes)

    itemsize = jnp.dtype(x3.dtype).itemsize
    sublane = _sublane_for(x3.dtype)
    c_cands = _tile_candidates(C, sublane)    # descending

    # --- one-pass path selection -------------------------------------------
    # Live VMEM per grid step: double-buffered input + output blocks (native
    # dtype) plus ~3 full-block f32 intermediates (cast, square, promoted y).
    one_bytes_per_elem = 4 * itemsize + 3 * 4

    one_pass_c = None
    if not force_two_pass:
        fitting = [c for c in c_cands
                   if N * c * HW * one_bytes_per_elem <= fit_budget]
        if fitting:
            # On multi-core parts make sure the "parallel" channel grid has
            # enough steps to shard across TensorCores.
            min_steps = 2 * num_cores if num_cores > 1 else 1
            for c in fitting:
                steps = C // c
                if steps >= min_steps and steps % num_cores == 0:
                    one_pass_c = c
                    break
            if one_pass_c is None:
                for c in fitting:
                    if C // c >= min_steps:
                        one_pass_c = c
                        break
            if one_pass_c is None:
                one_pass_c = fitting[0]       # largest fitting tile

    if one_pass_c is not None:
        out3 = _bnrelu_one_pass(x3, gamma2, beta2, one_pass_c, inv_count, vmem_limit)
    else:
        # --- two-pass tile selection ----------------------------------------
        two_bytes_per_elem = 4 * itemsize + 2 * 4
        if HW <= _LANE:
            l_opts = [HW]                                   # full (short) lane dim
        else:
            # Prefer the full spatial dim (1 lane-dense block per channel row),
            # otherwise a large 128-multiple tile with a masked tail.
            l_opts = [HW] + [l for l in (4096, 2048, 1024, 512, 256, 128) if l < HW]

        c_tile = l_tile = None
        for l in l_opts:
            for c in c_cands:
                if c * l * two_bytes_per_elem <= fit_budget:
                    c_tile, l_tile = c, l
                    break
            if c_tile is not None:
                break
        if c_tile is None:                                  # degenerate budgets
            c_tile = c_cands[-1]
            l_tile = HW if HW <= _LANE else _LANE
        out3 = _bnrelu_two_pass(x3, gamma2, beta2, c_tile, l_tile, inv_count,
                                vmem_limit)

    return out3.reshape(N, C, H, W)


# ----------------------------------------------------------------------------
# Pure-JAX reference: training-mode BN (batch stats, biased var) + ReLU6
# ----------------------------------------------------------------------------
def bnrelu_ref(x_nchw, gamma, beta):
    x = x_nchw.astype(jnp.float32)
    mean = jnp.mean(x, axis=(0, 2, 3), keepdims=True)
    var = jnp.mean((x - mean) ** 2, axis=(0, 2, 3), keepdims=True)
    xhat = (x - mean) * jax.lax.rsqrt(var + EPS)
    y = xhat * gamma.reshape(1, -1, 1, 1) + beta.reshape(1, -1, 1, 1)
    return jnp.clip(y, 0.0, 6.0)


if __name__ == "__main__":
    key = jax.random.PRNGKey(0)
    kx1, kg1, kb1, kx2, kg2, kb2, kx3, kg3, kb3 = jax.random.split(key, 9)

    # Case 1: small f32 NCHW -> fused one-pass path (stats + normalize + ReLU6
    # with x read from HBM exactly once).
    N, C, H, W = 2, 4, 16, 16
    x = jax.random.normal(kx1, (N, C, H, W), dtype=jnp.float32) * 3.0
    gamma = 1.0 + 0.1 * jax.random.normal(kg1, (C,), dtype=jnp.float32)
    beta = 0.1 * jax.random.normal(kb1, (C,), dtype=jnp.float32)
    out = jax.block_until_ready(bnrelu(x, gamma, beta))
    np.testing.assert_allclose(np.asarray(out), np.asarray(bnrelu_ref(x, gamma, beta)),
                               rtol=1e-5, atol=1e-5)

    # Case 2: force the tiled two-pass fallback with a non-128-multiple spatial
    # size (HW = 14*14 = 196) so the masked lane-tail stats path is exercised.
    N2, C2, H2, W2 = 2, 8, 14, 14
    x2 = jax.random.normal(kx2, (N2, C2, H2, W2), dtype=jnp.float32) * 2.0 + 1.0
    gamma_b = 1.0 + 0.1 * jax.random.normal(kg2, (C2,), dtype=jnp.float32)
    beta_b = 0.1 * jax.random.normal(kb2, (C2,), dtype=jnp.float32)
    out2 = jax.block_until_ready(
        bnrelu(x2, gamma_b, beta_b, block_budget_bytes=8192, force_two_pass=True))
    np.testing.assert_allclose(np.asarray(out2),
                               np.asarray(bnrelu_ref(x2, gamma_b, beta_b)),
                               rtol=1e-5, atol=1e-5)

    # Case 3: bf16 activations (dtype-aware sublane tiling, f32 stats inside).
    N3, C3, H3, W3 = 2, 32, 8, 8
    x3 = (jax.random.normal(kx3, (N3, C3, H3, W3), dtype=jnp.float32) * 3.0
          ).astype(jnp.bfloat16)
    gamma_c = 1.0 + 0.1 * jax.random.normal(kg3, (C3,), dtype=jnp.float32)
    beta_c = 0.1 * jax.random.normal(kb3, (C3,), dtype=jnp.float32)
    out3 = jax.block_until_ready(bnrelu(x3, gamma_c, beta_c))
    ref3 = bnrelu_ref(x3, gamma_c, beta_c)
    np.testing.assert_allclose(np.asarray(out3, dtype=np.float32), np.asarray(ref3),
                               rtol=5e-2, atol=5e-2)

    print("KERNEL_OK")
</pallas_src>

<mosaic_0001>
module attributes {stable_mosaic.version = 11 : i64} {
  func.func @_one_pass_kernel(%arg0: i32, %arg1: memref<2x4x256xf32, #tpu.memory_space<vmem>>, %arg2: memref<4x1xf32, #tpu.memory_space<vmem>>, %arg3: memref<4x1xf32, #tpu.memory_space<vmem>>, %arg4: memref<2x4x256xf32, #tpu.memory_space<vmem>>) attributes {dimension_semantics = [#tpu.dimension_semantics<parallel>], iteration_bounds = array<i64: 1>, scalar_prefetch = 0 : i64, scratch_operands = 0 : i64, tpu.core_type = #tpu.core_type<tc>, window_params = [{transform_indices = @transform_0, window_bounds = array<i64: 2, 4, 256>}, {transform_indices = @transform_1, window_bounds = array<i64: 4, 1>}, {transform_indices = @transform_2, window_bounds = array<i64: 4, 1>}, {transform_indices = @transform_3, window_bounds = array<i64: 2, 4, 256>}]} {
    %c0 = arith.constant 0 : index
    %c0_0 = arith.constant 0 : index
    %c0_1 = arith.constant 0 : index
    %0 = vector.load %arg1[%c0, %c0_0, %c0_1] : memref<2x4x256xf32, #tpu.memory_space<vmem>>, vector<2x4x256xf32>
    %cst = arith.constant dense<0.000000e+00> : vector<4x256xf32>
    %1 = vector.multi_reduction <add>, %0, %cst [0] : vector<2x4x256xf32> to vector<4x256xf32>
    %cst_2 = arith.constant dense<0.000000e+00> : vector<4xf32>
    %2 = vector.multi_reduction <add>, %1, %cst_2 [1] : vector<4x256xf32> to vector<4xf32>
    %3 = vector.shape_cast %2 : vector<4xf32> to vector<4x1xf32>
    %4 = arith.mulf %0, %0 : vector<2x4x256xf32>
    %cst_3 = arith.constant dense<0.000000e+00> : vector<4x256xf32>
    %5 = vector.multi_reduction <add>, %4, %cst_3 [0] : vector<2x4x256xf32> to vector<4x256xf32>
    %cst_4 = arith.constant dense<0.000000e+00> : vector<4xf32>
    %6 = vector.multi_reduction <add>, %5, %cst_4 [1] : vector<4x256xf32> to vector<4xf32>
    %7 = vector.shape_cast %6 : vector<4xf32> to vector<4x1xf32>
    %cst_5 = arith.constant 0.001953125 : f32
    %8 = vector.broadcast %cst_5 : f32 to vector<4x1xf32>
    %9 = arith.mulf %3, %8 : vector<4x1xf32>
    %cst_6 = arith.constant 0.001953125 : f32
    %10 = vector.broadcast %cst_6 : f32 to vector<4x1xf32>
    %11 = arith.mulf %7, %10 : vector<4x1xf32>
    %12 = arith.mulf %9, %9 : vector<4x1xf32>
    %13 = arith.subf %11, %12 : vector<4x1xf32>
    %cst_7 = arith.constant 0.000000e+00 : f32
    %14 = vector.broadcast %cst_7 : f32 to vector<4x1xf32>
    %15 = arith.maximumf %13, %14 : vector<4x1xf32>
    %c0_8 = arith.constant 0 : index
    %c0_9 = arith.constant 0 : index
    %16 = vector.load %arg2[%c0_8, %c0_9] : memref<4x1xf32, #tpu.memory_space<vmem>>, vector<4x1xf32>
    %cst_10 = arith.constant 9.99999974E-6 : f32
    %17 = vector.broadcast %cst_10 : f32 to vector<4x1xf32>
    %18 = arith.addf %15, %17 : vector<4x1xf32>
    %19 = math.rsqrt %18 : vector<4x1xf32>
    %20 = arith.mulf %16, %19 : vector<4x1xf32>
    %c0_11 = arith.constant 0 : index
    %c0_12 = arith.constant 0 : index
    %21 = vector.load %arg3[%c0_11, %c0_12] : memref<4x1xf32, #tpu.memory_space<vmem>>, vector<4x1xf32>
    %22 = arith.mulf %9, %20 : vector<4x1xf32>
    %23 = arith.subf %21, %22 : vector<4x1xf32>
    %24 = vector.shape_cast %20 : vector<4x1xf32> to vector<1x4x1xf32>
    %25 = vector.broadcast %24 : vector<1x4x1xf32> to vector<2x4x256xf32>
    %26 = arith.mulf %0, %25 : vector<2x4x256xf32>
    %27 = vector.shape_cast %23 : vector<4x1xf32> to vector<1x4x1xf32>
    %28 = vector.broadcast %27 : vector<1x4x1xf32> to vector<2x4x256xf32>
    %29 = arith.addf %26, %28 : vector<2x4x256xf32>
    %cst_13 = arith.constant 0.000000e+00 : f32
    %cst_14 = arith.constant 6.000000e+00 : f32
    %30 = vector.broadcast %cst_13 : f32 to vector<2x4x256xf32>
    %31 = arith.maximumf %30, %29 : vector<2x4x256xf32>
    %32 = vector.broadcast %cst_14 : f32 to vector<2x4x256xf32>
    %33 = arith.minimumf %32, %31 : vector<2x4x256xf32>
    %c0_15 = arith.constant 0 : index
    %c0_16 = arith.constant 0 : index
    %c0_17 = arith.constant 0 : index
    %34 = vector.load %arg4[%c0_15, %c0_16, %c0_17] : memref<2x4x256xf32, #tpu.memory_space<vmem>>, vector<2x4x256xf32>
    tpu.vector_store %arg4[%c0_15, %c0_16, %c0_17], %33 {strides = array<i32>} : memref<2x4x256xf32, #tpu.memory_space<vmem>>, vector<2x4x256xf32>,
    return
  }
  func.func @transform_0(%arg0: i32) -> (i32, i32, i32) {
    %c0_i32 = arith.constant 0 : i32
    %c0_i32_0 = arith.constant 0 : i32
    %c0_i32_1 = arith.constant 0 : i32
    return %c0_i32, %arg0, %c0_i32_0 : i32, i32, i32
  }
  func.func @transform_1(%arg0: i32) -> (i32, i32) {
    %c0_i32 = arith.constant 0 : i32
    %c0_i32_0 = arith.constant 0 : i32
    return %arg0, %c0_i32 : i32, i32
  }
  func.func @transform_2(%arg0: i32) -> (i32, i32) {
    %c0_i32 = arith.constant 0 : i32
    %c0_i32_0 = arith.constant 0 : i32
    return %arg0, %c0_i32 : i32, i32
  }
  func.func @transform_3(%arg0: i32) -> (i32, i32, i32) {
    %c0_i32 = arith.constant 0 : i32
    %c0_i32_0 = arith.constant 0 : i32
    %c0_i32_1 = arith.constant 0 : i32
    return %c0_i32, %arg0, %c0_i32_0 : i32, i32, i32
  }
}

</mosaic_0001>

<bundles_post_ra>
// kernel: tpu_custom_call.1
= control target key start
LH: loop header
LB: loop body
LE: loop exit
PB: predicated region body
PF: predicated region fallthrough
CT: control target
= control target key end

     0   :  { %8 = vsyncpa [#allocation3], 0  ;;  %s243_s0 = inlined_call_operand.hbm [shape: f32[2,4,256], index: 0, kind: input, shape index: {}]   ;;  %s244_s1 = inlined_call_operand.vmem [shape: f32[4,1], index: 1, kind: input, shape index: {}]   ;;  %s245_s2 = inlined_call_operand.vmem [shape: f32[4,1], index: 2, kind: input, shape index: {}]   ;;  %s246_s3 = inlined_call_operand.hbm [shape: f32[2,4,256], index: 3, kind: output, shape index: {}]  }
   0x1   :  { %9 = vsyncpa [#allocation4], 0  ;;  %s187_s12 = smov [#allocation2]  }
   0x2   :  { %s15_s13 = sshll.u32 %s187_s12, 4  ;;  %s16_s13 = int_to_ptr.vmem [resolvable:$true] %s15_s13 }
   0x3   :  { %s151_s14 = scalar_lea.vmem %s16_s13, 256  ;;  %p156_p1 = scmp.lt.s32.totalorder %s16_s13, %s16_s13 }
   0x4   :  { %p152_p0 = scmp.ne.s32.totalorder %s16_s13, %s151_s14  ;;  %p157_p2 = scmp.lt.s32.totalorder %s151_s14, %s151_s14 }
   0x6   :  { %p158_p3 = por %p157_p2, %p156_p1 }
   0x8   :  { %p159_p4 = pnand %p158_p3, %p152_p0 }
   0xa   :  { %162 = shalt.err (!%p159_p4)
}
   0xb   :  { %s188_s15 = smov 128   ;;  %s189_s16 = smov 8  }
   0xc   :  { %21 = dma.hbm_to_vmem [thread:$0]  %s243_s0, 256, %s16_s13, [#allocation3], %s188_s15, %s188_s15, %s189_s16  }
   0xd   :  { %183 = dma.done.wait [#allocation3], 256  }
   0xe   :  { %184 = vsyncadd [#allocation3], 4294967040  ;;  %vm37_vm0 = vcmask 1043456   ;;  %v29_v0 = vld [vmem:[#allocation2] sm:$0xff]  ;;  %v30_v1 = vld [vmem:[#allocation2 + $0x8] sm:$0xff]  ;;  %v190_v26 = vmov 0   ;;  %v87_v43 = vlaneseq }
   0xf   :  { %v33_v2 = vcombine.high %v29_v0, %v29_v0  ;;  %v34_v3 = vcombine.high %v30_v1, %v30_v1  ;;  %v38_v4 = vsel %vm37_vm0, %v29_v0, 0.0  ;;  %v39_v5 = vsel %vm37_vm0, %v30_v1, 0.0  ;;  %137 = vset.pattern.permute.xlu1 %v190_v26  ;;  %138 = vset.pattern.permute.xlu0 %v190_v26  ;;  %v73_v35 = vld [vmem:[%s244_s1] sm:$0xf]  ;;  %s192_s1 = smov [#allocation5]  }
  0x10   :  { %v40_v6 = vadd.f32 %v39_v5, %v38_v4  ;;  %v49_v7 = vmul.f32 %v29_v0, %v29_v0  ;;  %v50_v8 = vmul.f32 %v30_v1, %v30_v1  ;;  %v77_v38 = vld [vmem:[%s245_s2] sm:$0xf]  ;;  %v191_v41 = vmov 839922192   ;;  %s119_s2 = sshll.u32 %s192_s1, 4  ;;  %s120_s2 = int_to_ptr.vmem [resolvable:$true] %s119_s2 }
  0x11   :  { %v41_v9 = vsel %vm37_vm0, %v33_v2, 0.0  ;;  %v42_v10 = vsel %vm37_vm0, %v34_v3, 0.0  ;;  %v85_v42 = vunpack.c.l.s4 %v191_v41  ;;  %v88_v45 = vshrl.u32 %v87_v43, 7  ;;  %s163_s22 = scalar_lea.vmem %s120_s2, 256  ;;  %p168_p6 = scmp.lt.s32.totalorder %s120_s2, %s120_s2 }
  0x12   :  { %v43_v11 = vadd.f32 %v42_v10, %v41_v9  ;;  %v44_v12 = vsel %vm37_vm0, %v40_v6, 0.0  ;;  %v53_v13 = vcombine.high %v49_v7, %v49_v7  ;;  %v54_v14 = vcombine.high %v50_v8, %v50_v8  ;;  %p164_p5 = scmp.ne.s32.totalorder %s120_s2, %s163_s22  ;;  %p169_p7 = scmp.lt.s32.totalorder %s163_s22, %s163_s22 }
  0x13   :  { %v57_v15 = vsel %vm37_vm0, %v49_v7, 0.0  ;;  %v58_v16 = vsel %vm37_vm0, %v50_v8, 0.0  ;;  %v86_v44 = vunpack.c.0.s8 %v85_v42 }
  0x14   :  { %v45_v17 = vsel %vm37_vm0, %v43_v11, 0.0  ;;  %v59_v18 = vadd.f32 %v58_v16, %v57_v15  ;;  %v60_v19 = vsel %vm37_vm0, %v53_v13, 0.0  ;;  %v61_v20 = vsel %vm37_vm0, %v54_v14, 0.0  ;;  %p170_p8 = por %p169_p7, %p168_p6 }
  0x15   :  { %v46_v21 = vadd.f32 %v45_v17, %v44_v12  ;;  %v62_v22 = vadd.f32 %v61_v20, %v60_v19  ;;  %v89_v46 = vsub.s32 %v86_v44, %v88_v45 }
  0x16   :  { %v63_v23 = vsel %vm37_vm0, %v59_v18, 0.0  ;;  %p171_p9 = pnand %p170_p8, %p164_p5 }
  0x17   :  { %47 = vadd.xlane.f32.xlu0 %v46_v21  ;;  %v64_v24 = vsel %vm37_vm0, %v62_v22, 0.0 }
  0x18   :  { %v65_v25 = vadd.f32 %v64_v24, %v63_v23 }
  0x1b   :  { %66 = vadd.xlane.f32.xlu0 %v65_v25 }
  0xa0   :  { %v48_v27 = vpop.xlane.xlu0 %47 }
  0xa1   :  { %v68_v28 = vmul.f32 0.001953125, %v48_v27 }
  0xa3   :  { %v70_v30 = vmul.f32 %v68_v28, %v68_v28 }
  0xa4   :  { %v67_v29 = vpop.xlane.xlu0 %66 }
  0xa5   :  { %v69_v31 = vmul.f32 0.001953125, %v67_v29 }
  0xa7   :  { %v71_v32 = vsub.f32 %v69_v31, %v70_v30 }
  0xa9   :  { %v72_v33 = vmax.f32 %v71_v32, 0.0 }
  0xab   :  { %v74_v34 = vadd.f32 1e-05, %v72_v33 }
  0xad   :  { %141 = vrsqrt.f32 %v74_v34 }
  0xba   :  { %v142_v36 = vpop.eup %141 }
  0xbb   :  { %v76_v37 = vmul.f32 %v142_v36, %v73_v35 }
  0xbd   :  { %82 = vperm.xlu1 %137, %v76_v37   ;;  %v78_v39 = vmul.f32 %v76_v37, %v68_v28 }
  0xbf   :  { %v79_v40 = vsub.f32 %v77_v38, %v78_v39 }
  0xc1   :  { %96 = vperm.xlu1 %137, %v79_v40  }
 0x138   :  { %v83_v47 = vpop.permute.xlu1 %82 }
 0x139   :  { %v90_v48 = vrot.slane %v83_v47, %v89_v46 }
 0x13b   :  { %v92_v50 = vmul.f32 %v90_v48, %v29_v0  ;;  %v93_v51 = vmul.f32 %v90_v48, %v30_v1 }
 0x13c   :  { %v97_v49 = vpop.permute.xlu1 %96 }
 0x13d   :  { %v104_v52 = vrot.slane %v97_v49, %v89_v46 }
 0x13f   :  { %v106_v53 = vadd.f32 %v104_v52, %v92_v50  ;;  %v107_v54 = vadd.f32 %v104_v52, %v93_v51 }
 0x141   :  { %v108_v55 = vmax.f32 %v106_v53, 0.0  ;;  %v109_v56 = vmax.f32 %v107_v54, 0.0 }
 0x143   :  { %v110_v57 = vmin.f32 %v108_v55, 6.0  ;;  %v111_v58 = vmin.f32 %v109_v56, 6.0 }
 0x145   :  { %112 = vst [vmem:[#allocation5] sm:$0xff] %v110_v57  ;;  %113 = vst [vmem:[#allocation5 + $0x8] sm:$0xff] %v111_v58 }
 0x146   :  { %174 = shalt.err (!%p171_p9)
}
 0x147   :  { %125 = dma.vmem_to_hbm [thread:$0]  %s120_s2, 256, %s246_s3, [#allocation4], %s188_s15, %s188_s15, %s189_s16  }
 0x148   :  { %185 = dma.done.wait [#allocation4], 256  }
 0x149   :  { %186 = vsyncadd [#allocation4], 4294967040 }
 0x14a   :  { %129 = vsyncpa [#allocation3], 1 }
 0x14b   :  { %130 = vsyncpa [#allocation4], 1 }

</bundles_post_ra>
